<compile_context>
chip_gen: v7x
topology: tpu7x:2x2x1
jax: 0.10.0
libtpu: 0.0.40
codegen_flags: <defaults>
</compile_context>

<pallas_src>
import jax
import jax.numpy as jnp
from jax import lax
from jax.experimental import pallas as pl
from jax.experimental.pallas import tpu as pltpu


# ---------------------------------------------------------------------------
# Fast path: table resident in VMEM (small tables).
# ---------------------------------------------------------------------------
def _embedding_vmem_kernel(ids_ref, table_ref, out_ref):
    """Gather one (G, D) tile of rows from a VMEM-resident table.

    ids_ref   : SMEM int32 (N_pad,)   -- scalar-prefetched, pre-clamped indices
    table_ref : VMEM (max_pt, D)      -- full table, staged once (constant block)
    out_ref   : VMEM (G, D)           -- current pipelined output tile
    """
    blk = pl.program_id(0)
    g = out_ref.shape[0]
    base = blk * g
    # Static unroll: G is small on this path.  Each iteration is one scalar
    # SMEM read + one dynamic-sublane VMEM load + one row store.
    for k in range(g):
        row = ids_ref[base + k]
        out_ref[pl.ds(k, 1), :] = table_ref[pl.ds(row, 1), :]


# ---------------------------------------------------------------------------
# General path: table stays in HBM, rows DMAed straight into the out tile.
# ---------------------------------------------------------------------------
def _embedding_hbm_kernel(ids_ref, table_ref, out_ref, sem):
    """Gather one (G, D) tile of rows straight from HBM into the out tile.

    ids_ref   : SMEM int32 (N_pad,)   -- scalar-prefetched, pre-clamped indices
    table_ref : HBM  (max_pt, D)      -- never staged wholesale into VMEM
    out_ref   : VMEM (G, D)           -- current pipelined output tile (DMA dst)
    sem       : single DMA semaphore shared by all G row copies of this step
    """
    blk = pl.program_id(0)
    g, _ = out_ref.shape
    base = blk * g

    def issue(k, carry):
        row = ids_ref[base + k]
        pltpu.make_async_copy(
            table_ref.at[pl.ds(row, 1), :],   # one table row in HBM
            out_ref.at[pl.ds(k, 1), :],       # straight into the output tile
            sem,                               # shared semaphore
        ).start()
        return carry

    # Issue all G row DMAs back-to-back so many copies are in flight.
    if g <= 64:
        for k in range(g):                    # small G: plain static unroll
            issue(k, 0)
    else:
        # Bounded unroll keeps scalar-issue and code-size cost down for big G.
        lax.fori_loop(0, g, issue, 0, unroll=8)

    # All G copies signalled `sem`; one aggregate wait for the whole (G, D)
    # tile (G * D * itemsize bytes) replaces G per-row waits.  The wait must
    # finish inside this grid step so the pipelined writeback of out_ref
    # cannot race the in-flight copies.
    pltpu.make_async_copy(out_ref, out_ref, sem).wait()


# ---------------------------------------------------------------------------
# Wrapper
# ---------------------------------------------------------------------------
def embedding_forward(pt_id, table, *, block_ids=None,
                      vmem_table_bytes=4 * 1024 * 1024):
    """h_features = table[pt_id, :] computed inside a Pallas kernel."""
    n = int(pt_id.shape[0])
    max_pt, d = table.shape
    itemsize = jnp.dtype(table.dtype).itemsize
    use_vmem_table = max_pt * d * itemsize <= vmem_table_bytes

    # Vectorized clamp, once, in the wrapper (PyTorch raises on OOB ids; here
    # they are clamped so no silent OOB HBM/VMEM reads can ever happen).
    ids = jnp.clip(pt_id.astype(jnp.int32), 0, max_pt - 1)

    if block_ids is None:
        block_ids = 32 if use_vmem_table else 256
    # Ids per grid step: multiple of 8 sublanes (f32), but no bigger than the
    # rounded batch so tiny batches are not over-padded.
    g = max(8, min((block_ids // 8) * 8, pl.cdiv(n, 8) * 8))
    n_pad = pl.cdiv(n, g) * g
    if n_pad != n:
        # Pad with index 0; padded rows are discarded below.
        ids = jnp.pad(ids, (0, n_pad - n))

    grid = (n_pad // g,)
    out_shape = jax.ShapeDtypeStruct((n_pad, d), table.dtype)
    out_spec = pl.BlockSpec((g, d), lambda i, ids_ref: (i, 0))

    if use_vmem_table:
        out = pl.pallas_call(
            _embedding_vmem_kernel,
            out_shape=out_shape,
            grid_spec=pltpu.PrefetchScalarGridSpec(
                num_scalar_prefetch=1,                       # ids -> SMEM
                grid=grid,
                in_specs=[
                    # Full table, constant block index -> staged into VMEM once.
                    pl.BlockSpec((max_pt, d), lambda i, ids_ref: (0, 0)),
                ],
                out_specs=out_spec,
            ),
            compiler_params=pltpu.CompilerParams(
                dimension_semantics=("parallel",),           # 2-TC sharding (v7x)
            ),
            cost_estimate=pl.CostEstimate(
                flops=0, transcendentals=0,
                bytes_accessed=(max_pt + n_pad) * d * itemsize),
        )(ids, table)
    else:
        out = pl.pallas_call(
            _embedding_hbm_kernel,
            out_shape=out_shape,
            grid_spec=pltpu.PrefetchScalarGridSpec(
                num_scalar_prefetch=1,                       # ids -> SMEM
                grid=grid,
                in_specs=[
                    pl.BlockSpec(memory_space=pl.ANY),       # table stays in HBM
                ],
                out_specs=out_spec,
                scratch_shapes=[
                    pltpu.SemaphoreType.DMA(()),             # one shared DMA sem
                ],
            ),
            compiler_params=pltpu.CompilerParams(
                dimension_semantics=("parallel",),           # 2-TC sharding (v7x)
            ),
            cost_estimate=pl.CostEstimate(
                flops=0, transcendentals=0,
                bytes_accessed=2 * n_pad * d * itemsize),    # read N rows + write N rows
        )(ids, table)

    return out[:n]


def init_embedding_table(key, max_pt, in_features, dtype=jnp.float32):
    # xavier_normal_: std = sqrt(2 / (fan_in + fan_out)) for a
    # (max_pt, in_features) weight (fan_in=in_features, fan_out=max_pt).
    std = (2.0 / (max_pt + in_features)) ** 0.5
    return (std * jax.random.normal(key, (max_pt, in_features))).astype(dtype)


if __name__ == "__main__":
    in_features = 32
    max_pt = 16
    n_ids = 8

    key = jax.random.PRNGKey(0)
    k_w, k_id, k_w2, k_id2 = jax.random.split(key, 4)

    # Parameters (deterministic, synthetic -- no checkpoint load).
    theta_h = init_embedding_table(k_w, max_pt, in_features)
    pt_id = jax.random.randint(k_id, (n_ids,), 0, max_pt, dtype=jnp.int32)

    # 1) Small table (16x32 f32 = 2 KiB) -> VMEM-resident fast path.
    h_features = jax.block_until_ready(embedding_forward(pt_id, theta_h))
    ref = theta_h[pt_id, :]
    assert h_features.shape == (n_ids, in_features)
    assert jnp.allclose(h_features, ref), "VMEM path mismatch vs reference gather"

    # 2) Force the HBM manual-gather path (the real-vocab code path) on a
    #    different shape, including padding (n not a multiple of 8).
    max_pt2, d2, n2 = 300, 64, 37
    theta2 = init_embedding_table(k_w2, max_pt2, d2)
    pt_id2 = jax.random.randint(k_id2, (n2,), 0, max_pt2, dtype=jnp.int32)
    h2 = jax.block_until_ready(
        embedding_forward(pt_id2, theta2, vmem_table_bytes=0))
    assert h2.shape == (n2, d2)
    assert jnp.allclose(h2, theta2[pt_id2, :]), "HBM path mismatch vs reference gather"

    print("KERNEL_OK")
</pallas_src>

<mosaic_0001>
module attributes {stable_mosaic.version = 11 : i64} {
  func.func @_embedding_vmem_kernel(%arg0: i32, %arg1: memref<8xi32, #tpu.memory_space<smem>>, %arg2: memref<16x32xf32, #tpu.memory_space<vmem>>, %arg3: memref<8x32xf32, #tpu.memory_space<vmem>>) attributes {dimension_semantics = [#tpu.dimension_semantics<parallel>], iteration_bounds = array<i64: 1>, scalar_prefetch = 1 : i64, scratch_operands = 0 : i64, tpu.core_type = #tpu.core_type<tc>, window_params = [{pipeline_mode = #tpu.pipeline_mode<synchronous>, transform_indices = @transform_0, window_bounds = array<i64: 16, 32>}, {transform_indices = @transform_1, window_bounds = array<i64: 8, 32>}]} {
    %c8_i32 = arith.constant 8 : i32
    %0 = arith.muli %arg0, %c8_i32 : i32
    %c0_i32 = arith.constant 0 : i32
    %1 = arith.addi %0, %c0_i32 : i32
    %2 = arith.index_cast %1 : i32 to index
    %3 = memref.load %arg1[%2] : memref<8xi32, #tpu.memory_space<smem>>
    %4 = arith.index_cast %3 : i32 to index
    %c0 = arith.constant 0 : index
    %5 = vector.load %arg2[%4, %c0] : memref<16x32xf32, #tpu.memory_space<vmem>>, vector<1x32xf32>
    %c0_0 = arith.constant 0 : index
    %c0_1 = arith.constant 0 : index
    %6 = vector.load %arg3[%c0_0, %c0_1] : memref<8x32xf32, #tpu.memory_space<vmem>>, vector<1x32xf32>
    tpu.vector_store %arg3[%c0_0, %c0_1], %5 {strides = array<i32>} : memref<8x32xf32, #tpu.memory_space<vmem>>, vector<1x32xf32>,
    %c1_i32 = arith.constant 1 : i32
    %7 = arith.addi %0, %c1_i32 : i32
    %8 = arith.index_cast %7 : i32 to index
    %9 = memref.load %arg1[%8] : memref<8xi32, #tpu.memory_space<smem>>
    %10 = arith.index_cast %9 : i32 to index
    %c0_2 = arith.constant 0 : index
    %11 = vector.load %arg2[%10, %c0_2] : memref<16x32xf32, #tpu.memory_space<vmem>>, vector<1x32xf32>
    %c1 = arith.constant 1 : index
    %c0_3 = arith.constant 0 : index
    %12 = vector.load %arg3[%c1, %c0_3] : memref<8x32xf32, #tpu.memory_space<vmem>>, vector<1x32xf32>
    tpu.vector_store %arg3[%c1, %c0_3], %11 {strides = array<i32>} : memref<8x32xf32, #tpu.memory_space<vmem>>, vector<1x32xf32>,
    %c2_i32 = arith.constant 2 : i32
    %13 = arith.addi %0, %c2_i32 : i32
    %14 = arith.index_cast %13 : i32 to index
    %15 = memref.load %arg1[%14] : memref<8xi32, #tpu.memory_space<smem>>
    %16 = arith.index_cast %15 : i32 to index
    %c0_4 = arith.constant 0 : index
    %17 = vector.load %arg2[%16, %c0_4] : memref<16x32xf32, #tpu.memory_space<vmem>>, vector<1x32xf32>
    %c2 = arith.constant 2 : index
    %c0_5 = arith.constant 0 : index
    %18 = vector.load %arg3[%c2, %c0_5] : memref<8x32xf32, #tpu.memory_space<vmem>>, vector<1x32xf32>
    tpu.vector_store %arg3[%c2, %c0_5], %17 {strides = array<i32>} : memref<8x32xf32, #tpu.memory_space<vmem>>, vector<1x32xf32>,
    %c3_i32 = arith.constant 3 : i32
    %19 = arith.addi %0, %c3_i32 : i32
    %20 = arith.index_cast %19 : i32 to index
    %21 = memref.load %arg1[%20] : memref<8xi32, #tpu.memory_space<smem>>
    %22 = arith.index_cast %21 : i32 to index
    %c0_6 = arith.constant 0 : index
    %23 = vector.load %arg2[%22, %c0_6] : memref<16x32xf32, #tpu.memory_space<vmem>>, vector<1x32xf32>
    %c3 = arith.constant 3 : index
    %c0_7 = arith.constant 0 : index
    %24 = vector.load %arg3[%c3, %c0_7] : memref<8x32xf32, #tpu.memory_space<vmem>>, vector<1x32xf32>
    tpu.vector_store %arg3[%c3, %c0_7], %23 {strides = array<i32>} : memref<8x32xf32, #tpu.memory_space<vmem>>, vector<1x32xf32>,
    %c4_i32 = arith.constant 4 : i32
    %25 = arith.addi %0, %c4_i32 : i32
    %26 = arith.index_cast %25 : i32 to index
    %27 = memref.load %arg1[%26] : memref<8xi32, #tpu.memory_space<smem>>
    %28 = arith.index_cast %27 : i32 to index
    %c0_8 = arith.constant 0 : index
    %29 = vector.load %arg2[%28, %c0_8] : memref<16x32xf32, #tpu.memory_space<vmem>>, vector<1x32xf32>
    %c4 = arith.constant 4 : index
    %c0_9 = arith.constant 0 : index
    %30 = vector.load %arg3[%c4, %c0_9] : memref<8x32xf32, #tpu.memory_space<vmem>>, vector<1x32xf32>
    tpu.vector_store %arg3[%c4, %c0_9], %29 {strides = array<i32>} : memref<8x32xf32, #tpu.memory_space<vmem>>, vector<1x32xf32>,
    %c5_i32 = arith.constant 5 : i32
    %31 = arith.addi %0, %c5_i32 : i32
    %32 = arith.index_cast %31 : i32 to index
    %33 = memref.load %arg1[%32] : memref<8xi32, #tpu.memory_space<smem>>
    %34 = arith.index_cast %33 : i32 to index
    %c0_10 = arith.constant 0 : index
    %35 = vector.load %arg2[%34, %c0_10] : memref<16x32xf32, #tpu.memory_space<vmem>>, vector<1x32xf32>
    %c5 = arith.constant 5 : index
    %c0_11 = arith.constant 0 : index
    %36 = vector.load %arg3[%c5, %c0_11] : memref<8x32xf32, #tpu.memory_space<vmem>>, vector<1x32xf32>
    tpu.vector_store %arg3[%c5, %c0_11], %35 {strides = array<i32>} : memref<8x32xf32, #tpu.memory_space<vmem>>, vector<1x32xf32>,
    %c6_i32 = arith.constant 6 : i32
    %37 = arith.addi %0, %c6_i32 : i32
    %38 = arith.index_cast %37 : i32 to index
    %39 = memref.load %arg1[%38] : memref<8xi32, #tpu.memory_space<smem>>
    %40 = arith.index_cast %39 : i32 to index
    %c0_12 = arith.constant 0 : index
    %41 = vector.load %arg2[%40, %c0_12] : memref<16x32xf32, #tpu.memory_space<vmem>>, vector<1x32xf32>
    %c6 = arith.constant 6 : index
    %c0_13 = arith.constant 0 : index
    %42 = vector.load %arg3[%c6, %c0_13] : memref<8x32xf32, #tpu.memory_space<vmem>>, vector<1x32xf32>
    tpu.vector_store %arg3[%c6, %c0_13], %41 {strides = array<i32>} : memref<8x32xf32, #tpu.memory_space<vmem>>, vector<1x32xf32>,
    %c7_i32 = arith.constant 7 : i32
    %43 = arith.addi %0, %c7_i32 : i32
    %44 = arith.index_cast %43 : i32 to index
    %45 = memref.load %arg1[%44] : memref<8xi32, #tpu.memory_space<smem>>
    %46 = arith.index_cast %45 : i32 to index
    %c0_14 = arith.constant 0 : index
    %47 = vector.load %arg2[%46, %c0_14] : memref<16x32xf32, #tpu.memory_space<vmem>>, vector<1x32xf32>
    %c7 = arith.constant 7 : index
    %c0_15 = arith.constant 0 : index
    %48 = vector.load %arg3[%c7, %c0_15] : memref<8x32xf32, #tpu.memory_space<vmem>>, vector<1x32xf32>
    tpu.vector_store %arg3[%c7, %c0_15], %47 {strides = array<i32>} : memref<8x32xf32, #tpu.memory_space<vmem>>, vector<1x32xf32>,
    return
  }
  func.func @transform_0(%arg0: i32, %arg1: memref<8xi32, #tpu.memory_space<smem>>) -> (i32, i32) {
    %c0_i32 = arith.constant 0 : i32
    %c0_i32_0 = arith.constant 0 : i32
    %c0_i32_1 = arith.constant 0 : i32
    return %c0_i32, %c0_i32_0 : i32, i32
  }
  func.func @transform_1(%arg0: i32, %arg1: memref<8xi32, #tpu.memory_space<smem>>) -> (i32, i32) {
    %c0_i32 = arith.constant 0 : i32
    %c0_i32_0 = arith.constant 0 : i32
    return %arg0, %c0_i32 : i32, i32
  }
}

</mosaic_0001>

<bundles_post_ra>
// kernel: tpu_custom_call.1
= control target key start
LH: loop header
LB: loop body
LE: loop exit
PB: predicated region body
PF: predicated region fallthrough
CT: control target
= control target key end

     0   :  { %s235_s0 = inlined_call_operand.hbm [shape: s32[8], index: 0, kind: input, shape index: {}]   ;;  %s236_s1 = inlined_call_operand.hbm [shape: f32[16,32], index: 1, kind: input, shape index: {}]   ;;  %s237_s2 = inlined_call_operand.hbm [shape: f32[8,32], index: 2, kind: output, shape index: {}]  }
   0x1   :  { %s104_s11 = scalar_lea.hbm %s235_s0, 16 }
   0x2   :  { %p105_p0 = scmp.ne.s32.totalorder %s235_s0, %s104_s11  ;;  %p108_p1 = scmp.lt.u32.totalorder %s104_s11, %s235_s0 }
   0x4   :  { %p110_p2 = pnand %p108_p1, %p105_p0 }
   0x6   :  { %113 = shalt.err (!%p110_p2)  }
   0x7   :  { %s164_s16 = smov [#allocation3]  }
   0x8   :  { %8 = dma.hbm_to_smem %s235_s0, 16, %s164_s16, [#allocation2] }
   0x9   :  { %158 = dma.done.wait [#allocation2], 16 }
   0xa   :  { %159 = vsyncadd [#allocation2], 4294967280 }
   0xb   :  { %10 = sfence }
   0xc   :  { %11 = vsyncpa [#allocation5], 0 }
   0xd   :  { %12 = vsyncpa [#allocation6], 0  ;;  %s165_s19 = smov [#allocation4]   ;;  %s114_s23 = scalar_lea.hbm %s236_s1, 256 }
   0xe   :  { %s18_s20 = sshll.u32 %s165_s19, 4  ;;  %p115_p3 = scmp.ne.s32.totalorder %s236_s1, %s114_s23  ;;  %s19_s20 = int_to_ptr.vmem [resolvable:$true] %s18_s20 }
   0xf   :  { %p118_p4 = scmp.lt.u32.totalorder %s114_s23, %s236_s1 }
  0x11   :  { %p120_p5 = pnand %p118_p4, %p115_p3 }
  0x13   :  { %123 = shalt.err (!%p120_p5)
}
  0x14   :  { %s124_s0 = scalar_lea.vmem %s19_s20, 256  ;;  %p129_p7 = scmp.lt.s32.totalorder %s19_s20, %s19_s20 }
  0x15   :  { %p125_p6 = scmp.ne.s32.totalorder %s19_s20, %s124_s0  ;;  %p130_p8 = scmp.lt.s32.totalorder %s124_s0, %s124_s0 }
  0x17   :  { %p131_p9 = por %p130_p8, %p129_p7 }
  0x19   :  { %p132_p10 = pnand %p131_p9, %p125_p6 }
  0x1b   :  { %135 = shalt.err (!%p132_p10)
}
  0x1c   :  { %s166_s28 = smov 128   ;;  %s167_s29 = smov 8  }
  0x1d   :  { %24 = dma.hbm_to_vmem [thread:$0]  %s236_s1, 256, %s19_s20, [#allocation5], %s166_s28, %s166_s28, %s167_s29  }
  0x1e   :  { %160 = dma.done.wait [#allocation5], 256  }
  0x1f   :  { %161 = vsyncadd [#allocation5], 4294967040  ;;  %s29_s4 = sld [smem:[#allocation3]]  ;;  %s92_s5 = sld [smem:[#allocation3 + $0x1]]  ;;  %vm32_vm0 = vcmask 253952  }
  0x20   :  { %s93_s6 = sld [smem:[#allocation3 + $0x2]]  ;;  %s94_s7 = sld [smem:[#allocation3 + $0x3]] }
  0x21   :  { %s95_s8 = sld [smem:[#allocation3 + $0x4]]  ;;  %s96_s9 = sld [smem:[#allocation3 + $0x5]] }
  0x22   :  { %s97_s10 = sld [smem:[#allocation3 + $0x6]]  ;;  %s98_s11 = sld [smem:[#allocation3 + $0x7]] }
  0x23   :  { %s168_s12 = smov [#allocation7]  }
  0x24   :  { %s75_s13 = sshll.u32 %s168_s12, 4  ;;  %s208_s13 = int_to_ptr.vmem [resolvable:$true] %s75_s13 }
  0x25   :  { %s30_s14 = scalar_lea.vmem [#allocation4], %s29_s4  ;;  %s36_s15 = scalar_lea.vmem [#allocation4], %s92_s5 }
  0x26   :  { %v31_v0 = vld [vmem:[%s30_s14] sm:$0x1]  ;;  %s41_s1 = scalar_lea.vmem [#allocation4], %s93_s6  ;;  %s46_s16 = scalar_lea.vmem [#allocation4], %s94_s7 }
  0x27   :  { %v37_v1 = vld [vmem:[%s36_s15] sm:$0x1]  ;;  %33 = vst.msk [vmem:[#allocation7] sm:$0x1] %vm32_vm0, %v31_v0  ;;  %s51_s17 = scalar_lea.vmem [#allocation4], %s95_s8  ;;  %s56_s18 = scalar_lea.vmem [#allocation4], %s96_s9 }
  0x28   :  { %38 = vst.msk [vmem:[#allocation7 + $0x1] sm:$0x1] %vm32_vm0, %v37_v1  ;;  %v42_v2 = vld [vmem:[%s41_s1] sm:$0x1]  ;;  %s61_s19 = scalar_lea.vmem [#allocation4], %s97_s10  ;;  %s66_s20 = scalar_lea.vmem [#allocation4], %s98_s11 }
  0x29   :  { %v47_v3 = vld [vmem:[%s46_s16] sm:$0x1]  ;;  %43 = vst.msk [vmem:[#allocation7 + $0x2] sm:$0x1] %vm32_vm0, %v42_v2  ;;  %s136_s21 = scalar_lea.vmem %s208_s13, 128  ;;  %p141_p12 = scmp.lt.s32.totalorder %s208_s13, %s208_s13 }
  0x2a   :  { %48 = vst.msk [vmem:[#allocation7 + $0x3] sm:$0x1] %vm32_vm0, %v47_v3  ;;  %v52_v4 = vld [vmem:[%s51_s17] sm:$0x1]  ;;  %p137_p11 = scmp.ne.s32.totalorder %s208_s13, %s136_s21  ;;  %p142_p13 = scmp.lt.s32.totalorder %s136_s21, %s136_s21 }
  0x2b   :  { %v57_v5 = vld [vmem:[%s56_s18] sm:$0x1]  ;;  %53 = vst.msk [vmem:[#allocation7 + $0x4] sm:$0x1] %vm32_vm0, %v52_v4 }
  0x2c   :  { %58 = vst.msk [vmem:[#allocation7 + $0x5] sm:$0x1] %vm32_vm0, %v57_v5  ;;  %v62_v6 = vld [vmem:[%s61_s19] sm:$0x1]  ;;  %p143_p0 = por %p142_p13, %p141_p12 }
  0x2d   :  { %v67_v7 = vld [vmem:[%s66_s20] sm:$0x1]  ;;  %63 = vst.msk [vmem:[#allocation7 + $0x6] sm:$0x1] %vm32_vm0, %v62_v6 }
  0x2e   :  { %68 = vst.msk [vmem:[#allocation7 + $0x7] sm:$0x1] %vm32_vm0, %v67_v7  ;;  %p144_p1 = pnand %p143_p0, %p137_p11 }
  0x30   :  { %147 = shalt.err (!%p144_p1)
}
  0x31   :  { %s148_s24 = scalar_lea.hbm %s237_s2, 128 }
  0x32   :  { %p149_p2 = scmp.ne.s32.totalorder %s237_s2, %s148_s24  ;;  %p152_p3 = scmp.lt.u32.totalorder %s148_s24, %s237_s2 }
  0x34   :  { %p154_p4 = pnand %p152_p3, %p149_p2 }
  0x36   :  { %157 = shalt.err (!%p154_p4)
}
  0x37   :  { %78 = dma.vmem_to_hbm [thread:$0]  %s208_s13, 128, %s237_s2, [#allocation6]  }
  0x38   :  { %162 = dma.done.wait [#allocation6], 128  }
  0x39   :  { %163 = vsyncadd [#allocation6], 4294967168 }
  0x3a   :  { %82 = vsyncpa [#allocation5], 1 }
  0x3b   :  { %83 = vsyncpa [#allocation6], 1 }

</bundles_post_ra>
